<compile_context>
chip_gen: v7x
topology: tpu7x:2x2x1
jax: 0.10.0
libtpu: 0.0.40
codegen_flags: <defaults>
</compile_context>

<pallas_src>
import functools
import math

import numpy as np
import jax
import jax.numpy as jnp
from jax.experimental import pallas as pl
from jax.experimental.pallas import tpu as pltpu


def _round_up(x, m):
    return (x + m - 1) // m * m


def ema_kernel(mT_ref, apow_ref, corr_ref, x_ref, o_ref, carry_ref, *, reverse):
    # mT_ref:    (TB, TB)   transposed decay matrix (constant across grid)
    # apow_ref:  (1, TB)    carry decay powers      (constant across grid)
    # corr_ref:  (1, 1, TB) bias-correction row for this time tile
    # x_ref:     (NB, TB)   input tile  (series on sublanes, time on lanes)
    # o_ref:     (NB, TB)   output tile
    # carry_ref: (NB, 1)    EMA state carried across time tiles
    @pl.when(pl.program_id(1) == 0)
    def _():
        carry_ref[...] = jnp.zeros_like(carry_ref)

    mT = mT_ref[...]
    x_blk = x_ref[...].astype(mT.dtype)          # no-op when dtypes match
    # Closed form of the constant-coefficient recurrence over one time tile:
    #   forward: y[:, i] = sum_{j<=i} m*(1-m)^(i-j) x[:, j] + (1-m)^(i+1)*carry
    #   reverse: y[:, i] = sum_{j>=i} m*(1-m)^(j-i) x[:, j] + (1-m)^(TB-i)*carry
    # expressed as one MXU matmul plus a rank-1 carry term.
    y = jnp.dot(x_blk, mT, preferred_element_type=jnp.float32)
    y = y + carry_ref[...] * apow_ref[...]       # (NB,1)*(1,TB) -> (NB,TB)

    if reverse:
        carry_ref[...] = y[:, :1]                # state for the tile to the left
    else:
        carry_ref[...] = y[:, -1:]               # state for the tile to the right
    o_ref[...] = (y * corr_ref[0]).astype(o_ref.dtype)


def _ema_pass(x_pad, momentum, T_valid, TB, NB, reverse, initialization):
    """One (forward or reverse) EMA sweep over a padded (N_pad, T_pad) array."""
    a = 1.0 - momentum
    N_pad, T_pad = x_pad.shape
    num_t = T_pad // TB
    num_n = N_pad // NB

    # MXU operand dtype: native bf16 path when the data is bf16, f32 otherwise.
    mat_dtype = jnp.bfloat16 if x_pad.dtype == jnp.bfloat16 else jnp.float32

    # Host-side constants.
    i = np.arange(TB)
    diff = i[None, :] - i[:, None]                                 # [j, i] = i - j
    mT = np.where(diff >= 0, momentum * a ** np.clip(diff, 0, None), 0.0)
    if reverse:
        mT = mT.T                                                  # m*(1-m)^(j-i), j>=i
        apow = a ** (TB - i).astype(np.float64)                    # (1-m)^(TB-i)
    else:
        apow = a ** (i + 1.0)                                      # (1-m)^(i+1)
    mT = jnp.asarray(mT, mat_dtype)
    apow = jnp.asarray(apow, np.float32)[None, :]                  # (1, TB)

    t_all = np.arange(T_pad, dtype=np.float64)
    if initialization == "unbiased":
        expo = np.maximum(T_valid - t_all, 1.0) if reverse else t_all + 1.0
        corr = 1.0 / (1.0 - a ** expo)
    elif initialization == "zero":
        corr = np.ones_like(t_all)
    else:
        # TODO(synk): 'reflect' initialization (prepend 1/momentum reflected
        # samples) is not implemented in the Pallas path.
        raise NotImplementedError(initialization)
    # Zero the padded tail so the reverse sweep (and any consumer) sees exact
    # zeros beyond the valid sequence length.
    corr = np.where(t_all < T_valid, corr, 0.0)
    corr = jnp.asarray(corr, np.float32).reshape(num_t, 1, TB)     # lane-dense rows

    if reverse:
        t_map = lambda n, t: (n, num_t - 1 - t)
        corr_map = lambda n, t: (num_t - 1 - t, 0, 0)
    else:
        t_map = lambda n, t: (n, t)
        corr_map = lambda n, t: (t, 0, 0)

    return pl.pallas_call(
        functools.partial(ema_kernel, reverse=reverse),
        out_shape=jax.ShapeDtypeStruct((N_pad, T_pad), x_pad.dtype),
        grid_spec=pltpu.PrefetchScalarGridSpec(
            num_scalar_prefetch=0,
            grid=(num_n, num_t),
            in_specs=[
                pl.BlockSpec((TB, TB), lambda n, t: (0, 0)),   # decay matrix^T
                pl.BlockSpec((1, TB), lambda n, t: (0, 0)),    # carry powers
                pl.BlockSpec((1, 1, TB), corr_map),            # correction row
                pl.BlockSpec((NB, TB), t_map),                 # x tile
            ],
            out_specs=pl.BlockSpec((NB, TB), t_map),
            scratch_shapes=[pltpu.VMEM((NB, 1), jnp.float32)],
        ),
        compiler_params=pltpu.CompilerParams(
            dimension_semantics=("parallel", "arbitrary")),
    )(mT, apow, corr, x_pad)


def ema_pallas(x, momentum, *, initialization="unbiased", causal=True,
               t_block=128, n_block=2048):
    """Causal (or forward+backward) EMA along the last axis of `x`."""
    momentum = float(np.clip(momentum, 1e-6, 1.0))
    a = 1.0 - momentum

    orig_shape = x.shape
    T = orig_shape[-1]
    N = math.prod(orig_shape[:-1]) if len(orig_shape) > 1 else 1

    # (..., T) -> (N, T): series on sublanes, time on lanes.  No transpose.
    x2 = x.reshape(N, T)

    # Time tile: multiple of 128 (lane axis), capped at the filter's effective
    # memory so the decay matmul doesn't burn MXU on numerically-zero taps.
    if a <= 0.0:
        eff = 1
    else:
        eff = max(int(math.ceil(math.log(1e-7) / math.log(a))), 1)
    TB = min(_round_up(max(t_block, 1), 128), _round_up(eff, 128))
    T_pad = _round_up(T, 128)
    TB = min(TB, T_pad)
    T_pad = _round_up(T_pad, TB)

    # Channel tile: multiple of 8 (sublane axis); keep >= 2 tiles when possible
    # so both v7x TensorCores get work on the 'parallel' grid axis.
    N_pad = _round_up(N, 8)
    NB = min(n_block, N_pad)
    if N_pad // NB < 2 and N_pad >= 16:
        NB = _round_up(-(-N_pad // 2), 8)
    N_pad = _round_up(N_pad, NB)

    if (N_pad, T_pad) != (N, T):
        x2 = jnp.pad(x2, ((0, N_pad - N), (0, T_pad - T)))

    out = _ema_pass(x2, momentum, T, TB, NB, False, initialization)
    if not causal:
        # Backward sweep done in-kernel (reversed time grid + transposed decay
        # matrix) instead of two extra jnp.flip HBM passes.
        out = _ema_pass(out, momentum, T, TB, NB, True, initialization)

    if (N_pad, T_pad) != (N, T):
        out = out[:N, :T]
    return out.reshape(orig_shape)


def exponential_moving_average(x, momentum, *, initialization="unbiased",
                               causal=True, t_block=128, n_block=2048):
    """Mirrors ExponentialMovingAverage.forward (scalar, non-trainable momentum)."""
    if momentum is None:
        return x
    # TODO(synk): trainable (sigmoid-reparameterized) momentum and vector
    # momentum (num_filters output axis) are not implemented in the Pallas path.
    return ema_pallas(x, momentum, initialization=initialization, causal=causal,
                      t_block=t_block, n_block=n_block)


# ---------------- pure-JAX reference (mirrors the PyTorch module) -------------

def ema_ref(x, momentum, initialization="unbiased", causal=True):
    m = float(np.clip(momentum, 1e-6, 1.0))
    a = 1.0 - m

    def one_pass(xv):
        xt = jnp.moveaxis(xv, -1, 0)

        def step(carry, xi):
            y = a * carry + m * xi
            return y, y

        _, ys = jax.lax.scan(step, jnp.zeros_like(xt[0]), xt)
        y = jnp.moveaxis(ys, 0, -1)
        if initialization == "unbiased":
            t = jnp.arange(1, xv.shape[-1] + 1, dtype=jnp.float32)
            y = y / (1.0 - a ** t)
        return y

    y = one_pass(x)
    if not causal:
        y = jnp.flip(one_pass(jnp.flip(y, -1)), -1)
    return y


if __name__ == "__main__":
    # N = 2*8 = 16 -> two sublane tiles on the 'parallel' axis;
    # T = 300 -> padded to 384 = three 128-wide time tiles (exercises the carry).
    B, C, T = 2, 8, 300
    momentum = 0.1

    key = jax.random.PRNGKey(0)
    x = jax.random.normal(key, (B, C, T), jnp.float32)

    out = exponential_moving_average(x, momentum)
    out = jax.block_until_ready(out)
    ref = ema_ref(x, momentum)
    assert out.shape == (B, C, T)
    err = float(jnp.max(jnp.abs(out - ref)))
    assert jnp.allclose(out, ref, rtol=1e-3, atol=1e-3), f"causal mismatch, max err {err}"

    out_nc = exponential_moving_average(x, momentum, causal=False)
    out_nc = jax.block_until_ready(out_nc)
    ref_nc = ema_ref(x, momentum, causal=False)
    err_nc = float(jnp.max(jnp.abs(out_nc - ref_nc)))
    assert jnp.allclose(out_nc, ref_nc, rtol=1e-3, atol=1e-3), \
        f"non-causal mismatch, max err {err_nc}"

    print("KERNEL_OK")
</pallas_src>

<mosaic_0001>
module attributes {stable_mosaic.version = 11 : i64} {
  func.func @ema_kernel(%arg0: i32, %arg1: i32, %arg2: memref<128x128xf32, #tpu.memory_space<vmem>>, %arg3: memref<1x128xf32, #tpu.memory_space<vmem>>, %arg4: memref<1x1x128xf32, #tpu.memory_space<vmem>>, %arg5: memref<8x128xf32, #tpu.memory_space<vmem>>, %arg6: memref<8x128xf32, #tpu.memory_space<vmem>>, %arg7: memref<8x1xf32, #tpu.memory_space<vmem>>) attributes {dimension_semantics = [#tpu.dimension_semantics<parallel>, #tpu.dimension_semantics<arbitrary>], iteration_bounds = array<i64: 2, 3>, scalar_prefetch = 0 : i64, scratch_operands = 1 : i64, tpu.core_type = #tpu.core_type<tc>, window_params = [{pipeline_mode = #tpu.pipeline_mode<synchronous>, transform_indices = @transform_0, window_bounds = array<i64: 128, 128>}, {pipeline_mode = #tpu.pipeline_mode<synchronous>, transform_indices = @transform_1, window_bounds = array<i64: 1, 128>}, {transform_indices = @transform_2, window_bounds = array<i64: 1, 1, 128>}, {transform_indices = @transform_3, window_bounds = array<i64: 8, 128>}, {transform_indices = @transform_4, window_bounds = array<i64: 8, 128>}]} {
    %c0_i32 = arith.constant 0 : i32
    %0 = arith.cmpi eq, %arg1, %c0_i32 : i32
    %1 = arith.extui %0 : i1 to i32
    %c0_i32_0 = arith.constant 0 : i32
    %2 = arith.cmpi ne, %1, %c0_i32_0 : i32
    scf.if %2 {
      %cst_15 = arith.constant 0.000000e+00 : f32
      %19 = vector.broadcast %cst_15 : f32 to vector<8x1xf32>
      %c0_16 = arith.constant 0 : index
      %c0_17 = arith.constant 0 : index
      %20 = vector.load %arg7[%c0_16, %c0_17] : memref<8x1xf32, #tpu.memory_space<vmem>>, vector<8x1xf32>
      tpu.vector_store %arg7[%c0_16, %c0_17], %19 {strides = array<i32>} : memref<8x1xf32, #tpu.memory_space<vmem>>, vector<8x1xf32>,
    } else {
    }
    %c0 = arith.constant 0 : index
    %c0_1 = arith.constant 0 : index
    %3 = vector.load %arg2[%c0, %c0_1] : memref<128x128xf32, #tpu.memory_space<vmem>>, vector<128x128xf32>
    %c0_2 = arith.constant 0 : index
    %c0_3 = arith.constant 0 : index
    %4 = vector.load %arg5[%c0_2, %c0_3] : memref<8x128xf32, #tpu.memory_space<vmem>>, vector<8x128xf32>
    %cst = arith.constant dense<0.000000e+00> : vector<8x128xf32>
    %5 = tpu.matmul %4, %3, %cst {dimension_numbers = #tpu.dot_dimension_numbers<[1], [0], [0], [1], [0, 0, 1, 1], [], []>} : vector<8x128xf32>, vector<128x128xf32>, vector<8x128xf32> -> vector<8x128xf32>
    %c0_4 = arith.constant 0 : index
    %c0_5 = arith.constant 0 : index
    %6 = vector.load %arg7[%c0_4, %c0_5] : memref<8x1xf32, #tpu.memory_space<vmem>>, vector<8x1xf32>
    %c0_6 = arith.constant 0 : index
    %c0_7 = arith.constant 0 : index
    %7 = vector.load %arg3[%c0_6, %c0_7] : memref<1x128xf32, #tpu.memory_space<vmem>>, vector<1x128xf32>
    %8 = vector.broadcast %6 : vector<8x1xf32> to vector<8x128xf32>
    %9 = vector.broadcast %7 : vector<1x128xf32> to vector<8x128xf32>
    %10 = arith.mulf %8, %9 : vector<8x128xf32>
    %11 = arith.addf %5, %10 : vector<8x128xf32>
    %12 = vector.extract_strided_slice %11 {offsets = [0, 127], sizes = [8, 1], strides = [1, 1]} : vector<8x128xf32> to vector<8x1xf32>
    %c0_8 = arith.constant 0 : index
    %c0_9 = arith.constant 0 : index
    %13 = vector.load %arg7[%c0_8, %c0_9] : memref<8x1xf32, #tpu.memory_space<vmem>>, vector<8x1xf32>
    tpu.vector_store %arg7[%c0_8, %c0_9], %12 {strides = array<i32>} : memref<8x1xf32, #tpu.memory_space<vmem>>, vector<8x1xf32>,
    %c0_10 = arith.constant 0 : index
    %c0_11 = arith.constant 0 : index
    %c0_12 = arith.constant 0 : index
    %14 = vector.load %arg4[%c0_10, %c0_11, %c0_12] : memref<1x1x128xf32, #tpu.memory_space<vmem>>, vector<1x1x128xf32>
    %15 = vector.shape_cast %14 : vector<1x1x128xf32> to vector<1x128xf32>
    %16 = vector.broadcast %15 : vector<1x128xf32> to vector<8x128xf32>
    %17 = arith.mulf %11, %16 : vector<8x128xf32>
    %c0_13 = arith.constant 0 : index
    %c0_14 = arith.constant 0 : index
    %18 = vector.load %arg6[%c0_13, %c0_14] : memref<8x128xf32, #tpu.memory_space<vmem>>, vector<8x128xf32>
    tpu.vector_store %arg6[%c0_13, %c0_14], %17 {strides = array<i32>} : memref<8x128xf32, #tpu.memory_space<vmem>>, vector<8x128xf32>,
    return
  }
  func.func @transform_0(%arg0: i32, %arg1: i32) -> (i32, i32) {
    %c0_i32 = arith.constant 0 : i32
    %c0_i32_0 = arith.constant 0 : i32
    %c0_i32_1 = arith.constant 0 : i32
    return %c0_i32, %c0_i32_0 : i32, i32
  }
  func.func @transform_1(%arg0: i32, %arg1: i32) -> (i32, i32) {
    %c0_i32 = arith.constant 0 : i32
    %c0_i32_0 = arith.constant 0 : i32
    %c0_i32_1 = arith.constant 0 : i32
    return %c0_i32, %c0_i32_0 : i32, i32
  }
  func.func @transform_2(%arg0: i32, %arg1: i32) -> (i32, i32, i32) {
    %c0_i32 = arith.constant 0 : i32
    %c0_i32_0 = arith.constant 0 : i32
    %c0_i32_1 = arith.constant 0 : i32
    return %arg1, %c0_i32, %c0_i32_0 : i32, i32, i32
  }
  func.func @transform_3(%arg0: i32, %arg1: i32) -> (i32, i32) {
    %c0_i32 = arith.constant 0 : i32
    return %arg0, %arg1 : i32, i32
  }
  func.func @transform_4(%arg0: i32, %arg1: i32) -> (i32, i32) {
    %c0_i32 = arith.constant 0 : i32
    return %arg0, %arg1 : i32, i32
  }
}

</mosaic_0001>

<bundles_post_ra>
// kernel: tpu_custom_call.1
= control target key start
LH: loop header
LB: loop body
LE: loop exit
PB: predicated region body
PF: predicated region fallthrough
CT: control target
= control target key end

     0   :  { %s1158_s0 = inlined_call_operand.hbm [shape: f32[128,128], index: 0, kind: input, shape index: {}]   ;;  %s1159_s1 = inlined_call_operand.vmem [shape: f32[1,128], index: 1, kind: input, shape index: {}]   ;;  %s1160_s2 = inlined_call_operand.vmem [shape: f32[3,1,128], index: 2, kind: input, shape index: {}]   ;;  %s1161_s3 = inlined_call_operand.hbm [shape: f32[16,384], index: 3, kind: input, shape index: {}]   ;;  %s1162_s4 = inlined_call_operand.hbm [shape: f32[16,384], index: 4, kind: output, shape index: {}]  }
   0x1   :  { %1171 = sst [smem:[#allocation15_spill]] %s1158_s0 }
   0x2   :  { %1172 = sst [smem:[#allocation16_spill]] %s1162_s4 }
   0x3   :  { %9 = vsyncpa [#allocation4], 0 }
   0x4   :  { %10 = vsyncpa [#allocation7], 0 }
   0x5   :  { %12 = vsyncpa [#allocation7 + $0x1], 0 }
   0x6   :  { %13 = vsyncpa [#allocation5], 0 }
   0x7   :  { %15 = vsyncpa [#allocation5 + $0x1], 0  ;;  %s896_s15 = smov 0   ;;  %s898_s16 = smov 0  }
   0x8   :  { %s900_s17 = smov 0   ;;  %s902_s18 = smov 0  }
   0x9   :  { %s904_s19 = smov 0   ;;  %s906_s20 = smov 0  }
   0xa   :  { %s908_s21 = smov 0   ;;  %s910_s22 = smov 0  }
   0xb LB: > { %1173 = sst [smem:[#allocation12_spill]] %s830_s15  ;;  %s504_s23 = sadd.s32 4294967295, %s858_s22   ;;  %s858_s22 = sphi %s910_s22, %s21_s22   ;;  %s854_s21 = sphi %s908_s21, %s1201_s21   ;;  %s850_s20 = sphi %s906_s20, %s1200_s20   ;;  %s846_s19 = sphi %s904_s19, %s1199_s19   ;;  %s842_s18 = sphi %s902_s18, %s1198_s18   ;;  %s838_s17 = sphi %s900_s17, %s1197_s17   ;;  %s834_s16 = sphi %s898_s16, %s1196_s16   ;;  %s830_s15 = sphi %s896_s15, %s1195_s15  }
   0xc   : > { %s505_s24 = sadd.s32 4294967294, %s858_s22   ;;  %p123_p0 = scmp.ne.s32.totalorder %s834_s16, %s830_s15 }
   0xd   : > { %p940_p1 = scmp.eq.s32.totalorder %s504_s23, 0  ;;  %p944_p2 = scmp.eq.s32.totalorder %s504_s23, 5 }
   0xe   : > { %p155_p3 = scmp.eq.s32.totalorder %s505_s24, 5  ;;  %p506_p5 = scmp.ge.s32.totalorder %s858_s22, 1 }
   0xf   : > { %s1174_s25 = scalar_select %p940_p1, 1, 0 }
  0x10   : > { %s1175_s26 = scalar_select %p944_p2, 1, 0 }
  0x11   : > { %p950_p4 = por %p940_p1, %p123_p0  ;;  %p955_p6 = por %p155_p3, %p123_p0 }
  0x12   : > { %p162_p7 = scmp.lt.s32.totalorder %s858_s22, 7  ;;  %s860_s30 = smov [#allocation3]  }
  0x13   : > { %s1176_s27 = scalar_select %p950_p4, 1, 0 }
  0x14   : > { %s1177_s28 = scalar_select %p955_p6, 1, 0 }
  0x15   : > { %p960_p8 = pnand %p506_p5, %p162_p7  ;;  %s174_s5 = sshll.u32 %s860_s30, 4  ;;  %s175_s5 = int_to_ptr.vmem [resolvable:$true] %s174_s5 }
  0x16   : > { %1178 = sst [smem:[#allocation13_spill]] %s1177_s28  ;;  %s1181_s0 = sld [smem:[#allocation15_spill]] }
  0x17   : > { %s1179_s29 = scalar_select %p960_p8, 1, 0 }
  0x18   : > { %p608_p9 = pneg %p960_p8 }
  0x1a   : > { %p968_p10 = pnand %p608_p9, %p940_p1 }
  0x1c   : > { %s698_s9 = scalar_lea.hbm %s1181_s0, 2048  ;;  %p700_p12 = pneg %p968_p10 }
  0x1d   : > { %p699_p11 = scmp.ne.s32.totalorder %s1181_s0, %s698_s9  ;;  %p705_p3 = scmp.lt.u32.totalorder %s698_s9, %s1181_s0 }
  0x1f   : > { %p701_p13 = pnand %p700_p12, %p699_p11 }
  0x21   : > { %p702_p0 = pneg %p701_p13 }
  0x23   : > { %p707_p5 = pnand %p705_p3, %p702_p0 }
  0x25   : > { %710 = shalt.err (!%p707_p5)
}
  0x26   : > { %s711_s14 = scalar_lea.vmem %s175_s5, 2048  ;;  %p719_p4 = scmp.lt.s32.totalorder %s175_s5, %s175_s5 }
  0x27   : > { %p712_p7 = scmp.ne.s32.totalorder %s175_s5, %s711_s14  ;;  %p720_p1 = scmp.lt.s32.totalorder %s711_s14, %s711_s14 }
  0x29   : > { %p714_p9 = pnand %p712_p7, %p700_p12  ;;  %p721_p8 = por %p720_p1, %p719_p4 }
  0x2b   : > { %p715_p6 = pneg %p714_p9 }
  0x2d   : > { %p722_p2 = pnand %p721_p8, %p715_p6 }
  0x2f   : > { %725 = shalt.err (!%p722_p2)
}
  0x30   : > { %s861_s23 = smov 128   ;;  %s862_s24 = smov 8  }
  0x31   : > { %611 = dma.hbm_to_vmem [thread:$0]  (!%p968_p10), %s1181_s0, 2048, %s175_s5, [#allocation4], %s861_s23, %s861_s23, %s862_s24  }
  0x32   : > { %s30_s8 = sadd.s32 1, %s850_s20  ;;  %s33_s9 = sadd.s32 1, %s854_s21 }
  0x33   : > { %p31_p1 = scmp.ge.s32.totalorder %s30_s8, 3  ;;  %s110_s10 = sadd.s32 1, %s838_s17 }
  0x34   : > { %p117_p2 = scmp.ne.s32.totalorder %s838_s17, %s834_s16  ;;  %p118_p4 = scmp.eq.s32.totalorder %s858_s22, 0 }
  0x35   : > { %s1203_s8 = smov (%p31_p1, %s30_s8), 0  ;;  %s1205_s9 = smov (!%p31_p1, %s33_s9), %s854_s21 }
  0x36   : > { %1182 = sst [smem:[#allocation14_spill]] %s1203_s8  ;;  %s106_s11 = ssub.s32 %s850_s20, %s1203_s8 }
  0x37   : > { %p35_p6 = scmp.ge.s32.totalorder %s1205_s9, 2  ;;  %p1183_p8 = scmp.ne.s32.totalorder %s1175_s26, 0 }
  0x38   : > { %p1005_p10 = por %p118_p4, %p117_p2  ;;  %p621_p12 = scmp.lt.s32.totalorder %s858_s22, 6 }
  0x39   : > { %p1001_p11 = por %p1183_p8, %p117_p2  ;;  %s1207_s9 = smov (%p35_p6, %s1205_s9), 0 }
  0x3a   : > { %s197_s12 = sand.u32 1, %s838_s17   ;;  %s598_s13 = smul.u32 3, %s854_s21 }
  0x3b   : > { %s105_s14 = ssub.s32 %s854_s21, %s1207_s9  ;;  %s509_s24 = sshll.u32 %s197_s12, 3 }
  0x3c   : > { %s107_s23 = sor.u32 %s106_s11, %s105_s14  ;;  %s206_s26 = sadd.s32 %s850_s20, %s598_s13 }
  0x3d   : > { %p108_p13 = scmp.eq.s32.totalorder %s107_s23, 0  ;;  %s201_s30 = scalar_lea.vmem [#allocation6], %s509_s24 }
  0x3e   : > { %s210_s7 = sshll.u32 %s201_s30, 4  ;;  %s510_s8 = sshll.u32 %s206_s26, 7  ;;  %s1020_s7 = int_to_ptr.vmem [resolvable:$true] %s210_s7 }
  0x3f   : > { %s1018_s0 = scalar_select %p108_p13, %s838_s17, %s110_s10  }
  0x40   : > { %s1025_s4 = scalar_lea.hbm %s1161_s3, %s510_s8  ;;  %p1031_p0 = pnand %p621_p12, %p1005_p10 }
  0x41   : > { %s198_s10 = scalar_lea.sflag [#allocation7], %s197_s12  ;;  %s726_s13 = scalar_lea.hbm %s1025_s4, 128 }
  0x42   : > { %p727_p3 = scmp.ne.s32.totalorder %s1025_s4, %s726_s13  ;;  %p728_p5 = pneg %p1031_p0 }
  0x43   : > { %s731_s8 = scalar_lea.hbm %s1161_s3, 768  ;;  %p732_p1 = scmp.lt.u32.totalorder %s1025_s4, %s1161_s3 }
  0x44   : > { %p729_p7 = pnand %p728_p5, %p727_p3  ;;  %p733_p2 = scmp.lt.u32.totalorder %s731_s8, %s726_s13 }
  0x45   : > { %p735_p6 = scmp.lt.u32.totalorder %s726_s13, %s1025_s4 }
  0x46   : > { %p730_p9 = pneg %p729_p7  ;;  %p734_p4 = por %p733_p2, %p732_p1 }
  0x48   : > { %p736_p8 = por %p735_p6, %p734_p4 }
  0x4a   : > { %p737_p10 = pnand %p736_p8, %p730_p9 }
  0x4c   : > { %740 = shalt.err (!%p737_p10)
}
  0x4d   : > { %s741_s12 = scalar_lea.vmem %s1020_s7, 128  ;;  %s863_s23 = smov [#allocation6]  }
  0x4e   : > { %p742_p12 = scmp.ne.s32.totalorder %s1020_s7, %s741_s12  ;;  %s746_s24 = sshll.u32 %s863_s23, 4  ;;  %s747_s24 = int_to_ptr.vmem [resolvable:$false] %s746_s24 }
  0x4f   : > { %s748_s26 = scalar_lea.vmem %s747_s24, 256  ;;  %p749_p7 = scmp.lt.s32.totalorder %s1020_s7, %s747_s24 }
  0x50   : > { %p744_p13 = pnand %p742_p12, %p728_p5  ;;  %p750_p1 = scmp.lt.s32.totalorder %s748_s26, %s741_s12 }
  0x52   : > { %p745_p3 = pneg %p744_p13  ;;  %p751_p2 = por %p750_p1, %p749_p7 }
  0x54   : > { %p752_p4 = pnand %p751_p2, %p745_p3 }
  0x56   : > { %755 = shalt.err (!%p752_p4)
}
  0x57   : > { %615 = dma.hbm_to_vmem [thread:$0]  (!%p1031_p0), %s1025_s4, 128, %s1020_s7, %s198_s10  }
  0x58   : > { %p1187_p9 = scmp.ne.s32.totalorder %s1179_s29, 0 }
  0x59   : > { %p1188_p5 = scmp.ne.s32.totalorder (!%p1187_p9), %s1174_s25, 0 }
  0x5a   : > { %219 = sbr.rel (%p1187_p9) target bundleno = 476 (0x1dc), region = 36 }
  0x61   : > { %817 = dma.done.wait (%p1188_p5), [#allocation4], 2048  }
  0x62   : > { %819 = vsyncadd (%p1188_p5), [#allocation4], 4294965248  ;;  %s1067_s30 = sand.u32 1, %s834_s16   ;;  %p1189_p0 = scmp.ne.s32.totalorder %s1176_s27, 0 }
  0x63   : > { %s513_s13 = sshll.u32 %s1067_s30, 3  ;;  %s226_s11 = scalar_lea.sflag [#allocation7], %s1067_s30 }
  0x64   : > { %s1071_s15 = scalar_lea.vmem [#allocation6], %s513_s13 }
  0x65   : > { %821 = dma.done.wait (%p1189_p0), %s226_s11, 128  }
  0x66   : > { %823 = vsyncadd (%p1189_p0), %s226_s11, 4294967168  ;;  %p257_p6 = scmp.lt.s32.totalorder %s842_s18, 2  ;;  %s1085_s10 = scalar_lea.vmem [#allocation8], %s513_s13 }
  0x67   : > { %p515_p8 = scmp.ne.s32.totalorder %s842_s18, 0 }
  0x68   : > { %s1079_s4 = scalar_select %p257_p6, %s842_s18, 2 }
  0x69   : > { %263 = sbr.rel (%p515_p8) target bundleno = 112 (0x70), region = 48  ;;  %vm264_vm0 = vcmask (!%p515_p8), 7168   ;;  %v864_v0 = vmov (!%p515_p8), 0.0  }
  0x6a   : > { %s259_s7 = scalar_lea.vmem %s1160_s2, %s1079_s4  ;;  %265 = vst.msk [vmem:[#allocation2] sm:$0xff] (!%p515_p8), %vm264_vm0, %v864_v0 }
  0x70 PF: > { %v266_v1 = vld [vmem:[#allocation3] sm:$0xff]  ;;  %v267_v2 = vld [vmem:[#allocation3 + $0x8] sm:$0xff]  ;;  %v268_v3 = vld [vmem:[#allocation3 + $0x10] sm:$0xff]  ;;  %v865_v4 = vmov 0.0|0.0   ;;  %vm866_vm1 = vmmov 0   ;;  %v867_v7 = vmov 0.0  }
  0x71   : > { %574 = vmatprep.subr.bf16.mxu0 %v865_v4  ;;  %v575_v5 = vpack.c.bf16 %v267_v2, %v266_v1  ;;  %v269_v6 = vld [vmem:[#allocation3 + $0x18] sm:$0xff]  ;;  %571 = vmatprep.mubr.msk.f32.mxu0 %vm866_vm1, %v867_v7  ;;  %v868_v8 = vmov 0   ;;  %v270_v10 = vld [vmem:[#allocation3 + $0x20] sm:$0xff]  ;;  %v271_v11 = vld [vmem:[#allocation3 + $0x28] sm:$0xff]  ;;  %s599_s27 = smul.u32 3, %s846_s19  ;;  %s398_s24 = sshll.u32 %s1085_s10, 4  ;;  %s1105_s24 = int_to_ptr.vmem [resolvable:$true] %s398_s24 }
  0x72   : > { %697 = vset.pattern.permute.xlu0 %v868_v8  ;;  %v578_v9 = vpack.c.bf16 %v269_v6, %v268_v3  ;;  %v283_v12 = vld [vmem:[#allocation2] sm:$0xff]  ;;  %v581_v13 = vpack.c.bf16 %v271_v11, %v270_v10  ;;  %v272_v14 = vld [vmem:[#allocation3 + $0x30] sm:$0xff]  ;;  %v274_v17 = vld [vmem:[#allocation3 + $0x40] sm:$0xff]  ;;  %s869_s19 = smov 1   ;;  %s1190_s11 = sld [smem:[#allocation16_spill]] }
  0x73   : > { %576 = vmatpush3.bf16.msra.mxu0 %v575_v5  ;;  %287 = vperm.xlu0 %697, %v283_v12   ;;  %v273_v15 = vld [vmem:[#allocation3 + $0x38] sm:$0xff]  ;;  %v275_v18 = vld [vmem:[#allocation3 + $0x48] sm:$0xff]  ;;  %v276_v20 = vld [vmem:[#allocation3 + $0x50] sm:$0xff]  ;;  %s394_s5 = sadd.s32 %s842_s18, %s599_s27  ;;  %s383_s18 = scalar_lea.sflag [#allocation5], %s1067_s30 }
  0x74   : > { %577 = vmatprep.subr.bf16.mxu0 %v865_v4  ;;  %v584_v16 = vpack.c.bf16 %v273_v15, %v272_v14  ;;  %v587_v19 = vpack.c.bf16 %v275_v18, %v274_v17  ;;  %v277_v21 = vld [vmem:[#allocation3 + $0x58] sm:$0xff]  ;;  %v278_v23 = vld [vmem:[#allocation3 + $0x60] sm:$0xff]  ;;  %v279_v24 = vld [vmem:[#allocation3 + $0x68] sm:$0xff]  ;;  %s519_s23 = sshll.u32 %s394_s5, 7  ;;  %s756_s4 = scalar_lea.vmem %s1105_s24, 128 }
  0x75   : > { %v590_v22 = vpack.c.bf16 %v277_v21, %v276_v20  ;;  %v593_v25 = vpack.c.bf16 %v279_v24, %v278_v23  ;;  %v280_v26 = vld [vmem:[#allocation3 + $0x70] sm:$0xff]  ;;  %v281_v27 = vld [vmem:[#allocation3 + $0x78] sm:$0xff]  ;;  %v282_v29 = vld [vmem:[%s1071_s15] sm:$0xff]  ;;  %p757_p10 = scmp.ne.s32.totalorder %s1105_s24, %s756_s4  ;;  %s870_s25 = smov [#allocation8]  }
  0x76   : > { %v596_v28 = vpack.c.bf16 %v281_v27, %v280_v26  ;;  %v516_v30 = vld [vmem:[%s1159_s1] ss:$0 sm:$0xff]  ;;  %s760_s29 = sshll.u32 %s870_s25, 4  ;;  %s761_s29 = int_to_ptr.vmem [resolvable:$false] %s760_s29 }
  0x77   : > { %579 = vmatpush3.bf16.msra.mxu0 %v578_v9  ;;  %v517_v34 = vld [vmem:[%s259_s7] ss:$0 sm:$0xff]  ;;  %p758_p12 = pnand %p757_p10, %p1001_p11  ;;  %s762_s7 = scalar_lea.vmem %s761_s29, 256 }
  0x78   : > { %580 = vmatprep.subr.bf16.mxu0 %v865_v4  ;;  %s1103_s15 = scalar_lea.hbm %s1190_s11, %s519_s23  ;;  %p763_p3 = scmp.lt.s32.totalorder %s1105_s24, %s761_s29 }
  0x79   : > { %p759_p13 = pneg %p758_p12  ;;  %p764_p7 = scmp.lt.s32.totalorder %s762_s7, %s756_s4 }
  0x7b   : > { %582 = vmatpush3.bf16.msra.mxu0 %v581_v13  ;;  %p765_p1 = por %p764_p7, %p763_p3 }
  0x7c   : > { %583 = vmatprep.subr.bf16.mxu0 %v865_v4 }
  0x7d   : > { %p766_p2 = pnand %p765_p1, %p759_p13 }
  0x7f   : > { %585 = vmatpush3.bf16.msra.mxu0 %v584_v16 }
  0x80   : > { %586 = vmatprep.subr.bf16.mxu0 %v865_v4 }
  0x83   : > { %588 = vmatpush3.bf16.msra.mxu0 %v587_v19 }
  0x84   : > { %589 = vmatprep.subr.bf16.mxu0 %v865_v4 }
  0x87   : > { %591 = vmatpush3.bf16.msra.mxu0 %v590_v22 }
  0x88   : > { %592 = vmatprep.subr.bf16.mxu0 %v865_v4 }
  0x8b   : > { %594 = vmatpush3.bf16.msra.mxu0 %v593_v25 }
  0x8c   : > { %595 = vmatprep.subr.bf16.mxu0 %v865_v4 }
  0x8f   : > { %597 = vmatpush3.bf16.msra.mxu0 %v596_v28 }
  0x92   : > { %572 = vmatmul.mubr.f32.vlgmr.msra.gmra.mrb[0].mxu0 %v282_v29 }
  0xf2   : > { %v288_v31 = vpop.permute.xlu0 %287 }
  0xf3   : > { %v296_v32 = vmul.f32 %v516_v30, %v288_v31 }
 0x165   : > { %v363_v33 = vpop.f32.mrb[0].mxu0 }
 0x166   : > { %v364_v35 = vadd.f32 %v363_v33, %v296_v32  ;;  %v573_v36 = vpop.f32.mrb[1].mxu0 }
 0x168   : > { %v380_v37 = vmul.f32 %v517_v34, %v364_v35  ;;  %368 = vrot.lane.b32.xlu0 %v364_v35, %s869_s19 }
 0x16a   : > { %381 = vst [vmem:[%s1085_s10] sm:$0xff] %v380_v37 }
 0x16b   : > { %769 = shalt.err (!%p766_p2)
}
 0x16c   : > { %s770_s30 = scalar_lea.hbm %s1103_s15, 128  ;;  %s774_s28 = scalar_lea.hbm %s1190_s11, 768 }
 0x16d   : > { %p771_p4 = scmp.ne.s32.totalorder %s1103_s15, %s770_s30  ;;  %p775_p0 = scmp.lt.u32.totalorder %s1103_s15, %s1190_s11 }
 0x16e   : > { %p776_p6 = scmp.lt.u32.totalorder %s774_s28, %s770_s30  ;;  %p778_p10 = scmp.lt.u32.totalorder %s770_s30, %s1103_s15 }
 0x16f   : > { %p772_p9 = pnand %p771_p4, %p1001_p11 }
 0x170   : > { %p777_p8 = por %p776_p6, %p775_p0 }
 0x171   : > { %p773_p5 = pneg %p772_p9 }
 0x172   : > { %p779_p12 = por %p778_p10, %p777_p8 }
 0x174   : > { %p780_p13 = pnand %p779_p12, %p773_p5 }
 0x176   : > { %783 = shalt.err (!%p780_p13)
}
 0x177   : > { %606 = dma.vmem_to_hbm [thread:$0]  (%p1001_p11), %s1105_s24, 128, %s1103_s15, %s383_s18   ;;  %vm371_vm2 = vcmask 7168  }
 0x1da   : > { %v369_v38 = vpop.permute.xlu0 %368 }
 0x1db   : > { %372 = vst.msk [vmem:[#allocation2] sm:$0xff] %vm371_vm2, %v369_v38 }
 0x1dc PF: > { %s1191_s14 = sld [smem:[#allocation12_spill]]  ;;  %s1192_s12 = sld [smem:[#allocation13_spill]] }
 0x1dd   : > { %p623_p3 = scmp.ge.s32.totalorder %s858_s22, 2 }
 0x1e2   : > { %s410_s23 = sand.u32 1, %s1191_s14   ;;  %p1193_p7 = scmp.ne.s32.totalorder %s1192_s12, 0 }
 0x1e3   : > { %s411_s19 = scalar_lea.sflag [#allocation5], %s410_s23 }
 0x1e4   : > { %p617_p1 = pnand %p623_p3, %p1193_p7 }
 0x1e6   : > { %825 = dma.done.wait (!%p617_p1), %s411_s19, 128  }
 0x1e7   : > { %827 = vsyncadd (!%p617_p1), %s411_s19, 4294967168  ;;  %s21_s22 = sadd.s32 1, %s858_s22   ;;  %s1194_s6 = sld [smem:[#allocation14_spill]] }
 0x1e8   : > { %p18_p2 = scmp.ge.s32.totalorder %s21_s22, 8   ;;  %s1195_s15 = smov %s834_s16 }
 0x1e9   : > { %s1196_s16 = smov %s838_s17  ;;  %s1197_s17 = smov %s1018_s0 }
 0x1ea   : > { %s1198_s18 = smov %s850_s20  ;;  %s1199_s19 = smov %s854_s21 }
 0x1eb   : > { %s1201_s21 = smov %s1207_s9  ;;  %20 = sbr.rel (!%p18_p2) target bundleno = 11 (0xb), region = 93 }
 0x1ed   : > { %s1200_s20 = smov %s1194_s6 }
 0x1f2   :  { %416 = vsyncpa [#allocation4], 1 }
 0x1f3   :  { %418 = vsyncpa [#allocation4 + $0x1], 1 }
 0x1f4   :  { %419 = vsyncpa [#allocation7], 1 }
 0x1f5   :  { %421 = vsyncpa [#allocation7 + $0x1], 1 }
 0x1f6   :  { %422 = vsyncpa [#allocation5], 1 }
 0x1f7   :  { %424 = vsyncpa [#allocation5 + $0x1], 1 }

</bundles_post_ra>
